<compile_context>
chip_gen: v6e
topology: v6e:2x2x1
jax: 0.10.0
libtpu: 0.0.40
codegen_flags: <defaults>
</compile_context>

<pallas_src>
import jax
import jax.numpy as jnp
from jax.experimental import pallas as pl
from jax.experimental.pallas import tpu as pltpu

HIDDEN = 768   # BERT hidden size (fixed by nn.Linear(768, 384))
MID = 384


def _round_up(x, m):
    return (x + m - 1) // m * m


def _round_down(x, m):
    return (x // m) * m


def head_kernel(x_ref, wf_ref, bf_ref, o_ref):
    # x_ref:  [TB, 768]       activations (f32 or bf16), batch-tiled
    # wf_ref: [1, 768]        fused weight row (same dtype as x), grid-resident
    # bf_ref: [1, 1]   f32    fused bias scalar (SMEM)
    # o_ref:  [TB//128, 128]  f32 lane-dense output (row-major flat == batch order)
    rows = o_ref.shape[0]
    hidden = x_ref.shape[-1]
    x = x_ref[...].astype(jnp.float32)
    w = wf_ref[...].astype(jnp.float32)
    # VPU multiply + XLU lane-reduce.  Deliberately NOT jnp.dot: an N=1 matmul
    # wastes 255/256 of the MXU and this kernel is HBM-bound anyway.
    prod = x * w                                              # [TB, 768] f32
    # Sublane-split-only reshape (layout-free), then reduce the lane axis so
    # the per-tile result is lane-dense instead of a 1-lane-wide column.
    logits = jnp.sum(prod.reshape(rows, 128, hidden), axis=-1) + bf_ref[0, 0]
    o_ref[...] = jax.nn.sigmoid(logits)


def fuse_head_params(w1, b1, w2, b2):
    """Fuse linear1/linear2 ONCE at model-load time (hoisted out of the per-call
    path so w1 (1.18 MB) is never re-read per inference call).

    w1: [768, 384] (torch linear1.weight.T), b1: [1, 384],
    w2: [1, 384]   (torch linear2.weight),   b2: [1, 1].

    # TODO(synk): this algebraic fusion is only valid while dropout is the
    # identity (inference); training-mode dropout would need the two-layer form.
    """
    w_fused = (w1 @ w2.T).reshape(1, HIDDEN)                     # [1, 768]
    b_fused = (b1 @ w2.T + b2).reshape(1, 1).astype(jnp.float32)  # [1, 1]
    return w_fused, b_fused


def mymodel_head(pooled, w_fused, b_fused, *, tb=1024):
    """pooled: [B, 768] (f32 or bf16) -> [B] f32, matching sigmoid(...).squeeze(1).

    tb = batch tile; 1024 default (sweep 1024-2048). Keep x tile x 2 buffers
    well inside scoped VMEM (limit raised below).
    """
    B, H = pooled.shape
    assert H == HIDDEN

    # Stream the fused weight at the activation dtype (bf16 halves the only
    # traffic that matters); the kernel accumulates in f32.
    w_f = w_fused.astype(pooled.dtype)
    b_f = b_fused.reshape(1, 1).astype(jnp.float32)

    if B > 1024 and B > tb:
        # Multi-tile path.  tb must be a multiple of 1024 so the lane-dense
        # output block (tb//128, 128) has a sublane dim divisible by 8, and we
        # cap it so there are >= ~4 tiles for v7x's two TensorCores.
        # No jnp.pad of x: grid = cdiv(B, tb); the ragged last block's OOB rows
        # are undefined and simply sliced off below (nothing reduces over them).
        tb = max(1024, _round_down(tb, 1024))
        tb = min(tb, max(1024, _round_down(pl.cdiv(B, 4), 1024)))
        grid = pl.cdiv(B, tb)
        x = pooled
    else:
        # Single-tile path (small batch): pad up to the 128-lane output granule.
        # Padding here is cheap (one small tile) and pads are zeros, so the
        # padded outputs are sigmoid(b_fused) (no NaN) and get sliced off.
        tb = _round_up(max(B, 128), 128)
        grid = 1
        pad = tb - B
        x = jnp.pad(pooled, ((0, pad), (0, 0))) if pad else pooled

    out_rows = grid * (tb // 128)

    out = pl.pallas_call(
        head_kernel,
        out_shape=jax.ShapeDtypeStruct((out_rows, 128), jnp.float32),
        grid=(grid,),
        in_specs=[
            pl.BlockSpec((tb, HIDDEN), lambda i: (i, 0)),        # x: batch-tiled
            pl.BlockSpec((1, HIDDEN), lambda i: (0, 0)),         # fused weight (resident)
            pl.BlockSpec(memory_space=pltpu.MemorySpace.SMEM),   # fused bias scalar
        ],
        out_specs=pl.BlockSpec((tb // 128, 128), lambda i: (i, 0)),
        compiler_params=pltpu.CompilerParams(
            # Batch tiles are independent -> shard across both TCs on v7x;
            # harmless (sequential) on v5e/v6e.
            dimension_semantics=("parallel",),
            # Big tiles + double buffering exceed v5e's 16 MiB default scoped VMEM.
            vmem_limit_bytes=64 * 1024 * 1024,
        ),
    )(x, w_f, b_f)

    # Lane-dense (out_rows, 128) -> flat batch order -> drop padded/ragged rows.
    return out.reshape(-1)[:B]


def fake_bert_cls(input_ids, attention_mask, emb_table):
    # TODO(synk): the real BERT encoder (self-attention stack) is an external
    # injected module in the PyTorch code and is not reimplemented; this
    # deterministic embedding lookup stands in for `bert(...)[0][:, 0]`.
    cls = emb_table[input_ids[:, 0]]                                  # [B, 768]
    return cls * attention_mask[:, 0][:, None].astype(cls.dtype)


if __name__ == "__main__":
    B, S, VOCAB = 16, 8, 32

    key = jax.random.PRNGKey(0)
    k_ids, k_emb, k_w1, k_b1, k_w2, k_b2, k_big = jax.random.split(key, 7)

    input_ids = jax.random.randint(k_ids, (B, S), 0, VOCAB)
    attention_mask = jnp.ones((B, S), dtype=jnp.int32)

    # Deterministic synthetic parameters (not a checkpoint load).
    emb_table = jax.random.normal(k_emb, (VOCAB, HIDDEN), jnp.float32) * 0.02
    w1 = jax.random.normal(k_w1, (HIDDEN, MID), jnp.float32) * 0.02   # linear1.weight.T
    b1 = jax.random.normal(k_b1, (1, MID), jnp.float32) * 0.02        # linear1.bias
    w2 = jax.random.normal(k_w2, (1, MID), jnp.float32) * 0.02        # linear2.weight
    b2 = jax.random.normal(k_b2, (1, 1), jnp.float32) * 0.02          # linear2.bias

    # Fuse the head once, outside the per-call path.
    w_fused, b_fused = fuse_head_params(w1, b1, w2, b2)

    def ref_fn(x):  # pure-JAX unfused reference
        return jax.nn.sigmoid((x @ w1 + b1) @ w2.T + b2)[:, 0]

    # "bert(...)[0][:, 0]" -> CLS-token pooled output, [B, 768]
    pooled = fake_bert_cls(input_ids, attention_mask, emb_table)

    # 1) Small batch, f32 (single-tile / padded-to-128 path).
    out = jax.block_until_ready(mymodel_head(pooled, w_fused, b_fused))
    assert out.shape == (B,)
    assert jnp.allclose(out, ref_fn(pooled), atol=1e-5, rtol=1e-5)

    # 2) bf16 activation streaming path (same batch, looser tolerance).
    out_bf16 = jax.block_until_ready(
        mymodel_head(pooled.astype(jnp.bfloat16), w_fused, b_fused))
    assert out_bf16.shape == (B,)
    assert jnp.allclose(out_bf16, ref_fn(pooled), atol=2e-3, rtol=0)

    # 3) Multi-tile path with a ragged last block (grid > 1, no jnp.pad of x).
    B2 = 2304
    pooled2 = jax.random.normal(k_big, (B2, HIDDEN), jnp.float32) * 0.02
    out2 = jax.block_until_ready(mymodel_head(pooled2, w_fused, b_fused, tb=1024))
    assert out2.shape == (B2,)
    assert jnp.allclose(out2, ref_fn(pooled2), atol=1e-5, rtol=1e-5)

    print("KERNEL_OK")
</pallas_src>

<mosaic_0001>
module attributes {stable_mosaic.version = 11 : i64} {
  func.func @head_kernel(%arg0: i32, %arg1: memref<128x768xf32, #tpu.memory_space<vmem>>, %arg2: memref<1x768xf32, #tpu.memory_space<vmem>>, %arg3: memref<1x1xf32, #tpu.memory_space<smem>>, %arg4: memref<1x128xf32, #tpu.memory_space<vmem>>) attributes {dimension_semantics = [#tpu.dimension_semantics<parallel>], iteration_bounds = array<i64: 1>, scalar_prefetch = 0 : i64, scratch_operands = 0 : i64, tpu.core_type = #tpu.core_type<tc>, window_params = [{transform_indices = @transform_0, window_bounds = array<i64: 128, 768>}, {pipeline_mode = #tpu.pipeline_mode<synchronous>, transform_indices = @transform_1, window_bounds = array<i64: 1, 768>}, {transform_indices = @transform_2, window_bounds = array<i64: 1, 1>}, {transform_indices = @transform_3, window_bounds = array<i64: 1, 128>}]} {
    %c0 = arith.constant 0 : index
    %c0_0 = arith.constant 0 : index
    %0 = vector.load %arg1[%c0, %c0_0] : memref<128x768xf32, #tpu.memory_space<vmem>>, vector<128x768xf32>
    %c0_1 = arith.constant 0 : index
    %c0_2 = arith.constant 0 : index
    %1 = vector.load %arg2[%c0_1, %c0_2] : memref<1x768xf32, #tpu.memory_space<vmem>>, vector<1x768xf32>
    %2 = vector.broadcast %1 : vector<1x768xf32> to vector<128x768xf32>
    %3 = arith.mulf %0, %2 : vector<128x768xf32>
    %4 = vector.shape_cast %3 : vector<128x768xf32> to vector<1x128x768xf32>
    %cst = arith.constant dense<0.000000e+00> : vector<1x128xf32>
    %5 = vector.multi_reduction <add>, %4, %cst [2] : vector<1x128x768xf32> to vector<1x128xf32>
    %c0_3 = arith.constant 0 : index
    %c0_4 = arith.constant 0 : index
    %6 = memref.load %arg3[%c0_3, %c0_4] : memref<1x1xf32, #tpu.memory_space<smem>>
    %7 = vector.broadcast %6 : f32 to vector<1x128xf32>
    %8 = arith.addf %5, %7 : vector<1x128xf32>
    %9 = arith.negf %8 : vector<1x128xf32>
    %10 = math.exp %9 : vector<1x128xf32>
    %cst_5 = arith.constant 1.000000e+00 : f32
    %11 = vector.broadcast %cst_5 : f32 to vector<1x128xf32>
    %12 = arith.addf %11, %10 : vector<1x128xf32>
    %13 = arith.divf %11, %12 : vector<1x128xf32>
    %c0_6 = arith.constant 0 : index
    %c0_7 = arith.constant 0 : index
    %14 = vector.load %arg4[%c0_6, %c0_7] : memref<1x128xf32, #tpu.memory_space<vmem>>, vector<1x128xf32>
    tpu.vector_store %arg4[%c0_6, %c0_7], %13 {strides = array<i32>} : memref<1x128xf32, #tpu.memory_space<vmem>>, vector<1x128xf32>,
    return
  }
  func.func @transform_0(%arg0: i32) -> (i32, i32) {
    %c0_i32 = arith.constant 0 : i32
    %c0_i32_0 = arith.constant 0 : i32
    return %arg0, %c0_i32 : i32, i32
  }
  func.func @transform_1(%arg0: i32) -> (i32, i32) {
    %c0_i32 = arith.constant 0 : i32
    %c0_i32_0 = arith.constant 0 : i32
    %c0_i32_1 = arith.constant 0 : i32
    return %c0_i32, %c0_i32_0 : i32, i32
  }
  func.func @transform_2(%arg0: i32) -> (i32, i32) {
    %c0_i32 = arith.constant 0 : i32
    %c0_i32_0 = arith.constant 0 : i32
    %c0_i32_1 = arith.constant 0 : i32
    return %c0_i32, %c0_i32_0 : i32, i32
  }
  func.func @transform_3(%arg0: i32) -> (i32, i32) {
    %c0_i32 = arith.constant 0 : i32
    %c0_i32_0 = arith.constant 0 : i32
    return %arg0, %c0_i32 : i32, i32
  }
}

</mosaic_0001>

<bundles_post_ra>
// kernel: tpu_custom_call.1
= control target key start
LH: loop header
LB: loop body
LE: loop exit
PB: predicated region body
PF: predicated region fallthrough
CT: control target
= control target key end

     0   :  { %9 = vsyncpa [#allocation4], 0  ;;  %s997_s0 = inlined_call_operand.hbm [shape: f32[128,768], index: 0, kind: input, shape index: {}]   ;;  %s998_s1 = inlined_call_operand.hbm [shape: f32[1,768], index: 1, kind: input, shape index: {}]   ;;  %s999_s2 = inlined_call_operand.<no memory space> [shape: f32[1,1], index: 2, kind: input, shape index: {}]   ;;  %s1000_s3 = inlined_call_operand.hbm [shape: f32[1,128], index: 3, kind: output, shape index: {}]  }
   0x1   :  { %10 = vsyncpa [#allocation7], 0 }
   0x2   :  { %11 = vsyncpa [#allocation5], 0  ;;  %s788_s12 = smov [#allocation3]  }
   0x3   :  { %s17_s13 = sshll.u32 %s788_s12, 4  ;;  %s18_s13 = int_to_ptr.vmem [resolvable:$true] %s17_s13 }
   0x4   :  { %s730_s14 = scalar_lea.vmem %s18_s13, 12288  ;;  %p735_p1 = scmp.lt.s32.totalorder %s18_s13, %s18_s13 }
   0x5   :  { %p731_p0 = scmp.ne.s32.totalorder %s18_s13, %s730_s14  ;;  %p736_p2 = scmp.lt.s32.totalorder %s730_s14, %s730_s14 }
   0x7   :  { %p737_p3 = por %p736_p2, %p735_p1 }
   0x9   :  { %p738_p4 = pnand %p737_p3, %p731_p0 }
   0xb   :  { %741 = shalt.err (!%p738_p4)
}
   0xc   :  { %s789_s15 = smov 768   ;;  %s790_s16 = smov 48  }
   0xd   :  { %23 = dma.hbm_to_vmem [thread:$0]  %s997_s0, 12288, %s18_s13, [#allocation4], %s789_s15, %s789_s15, %s790_s16  }
   0xe   :  { %s791_s19 = smov [#allocation6]  }
   0xf   :  { %s30_s20 = sshll.u32 %s791_s19, 4  ;;  %s31_s20 = int_to_ptr.vmem [resolvable:$true] %s30_s20 }
  0x10   :  { %s750_s21 = scalar_lea.vmem %s31_s20, 96  ;;  %p755_p6 = scmp.lt.s32.totalorder %s31_s20, %s31_s20 }
  0x11   :  { %p751_p5 = scmp.ne.s32.totalorder %s31_s20, %s750_s21  ;;  %p756_p7 = scmp.lt.s32.totalorder %s750_s21, %s750_s21 }
  0x13   :  { %p757_p8 = por %p756_p7, %p755_p6 }
  0x15   :  { %p758_p9 = pnand %p757_p8, %p751_p5 }
  0x17   :  { %761 = shalt.err (!%p758_p9)
}
  0x18   :  { %33 = dma.hbm_to_vmem [thread:$0]  %s998_s1, 96, %s31_s20, [#allocation7]  }
  0x19   :  { %782 = dma.done.wait [#allocation4], 12288  }
  0x1a   :  { %783 = vsyncadd [#allocation4], 4294955008 }
  0x1b   :  { %784 = dma.done.wait [#allocation7], 96  }
  0x1c   :  { %785 = vsyncadd [#allocation7], 4294967200  ;;  %v140_v0 = vlaneseq  ;;  %v42_v8 = vld [vmem:[#allocation3] sm:$0xff]  ;;  %v43_v9 = vld [vmem:[#allocation3 + $0x8] sm:$0xff]  ;;  %vm519_vm0 = vcmask 130112   ;;  %vm526_vm1 = vcmask 195712  }
  0x1d   :  { %v44_v10 = vld [vmem:[#allocation3 + $0x10] sm:$0xff]  ;;  %v138_v11 = vld [vmem:[#allocation6] sm:$0x3f]  ;;  %v45_v12 = vld [vmem:[#allocation3 + $0x18] sm:$0xff]  ;;  %vm533_vm2 = vcmask 261312   ;;  %vm540_vm3 = vcmask 326912  }
  0x1e   :  { %v820_v1 = vshrl.u32 %v140_v0, 7  ;;  %v54_v17 = vld [vmem:[#allocation3 + $0x60] sm:$0xff]  ;;  %v55_v18 = vld [vmem:[#allocation3 + $0x68] sm:$0xff]  ;;  %v56_v23 = vld [vmem:[#allocation3 + $0x70] sm:$0xff]  ;;  %vm547_vm4 = vcmask 392512   ;;  %vm554_vm5 = vcmask 458112  }
  0x1f   :  { %v46_v19 = vld [vmem:[#allocation3 + $0x20] sm:$0xff]  ;;  %v47_v20 = vld [vmem:[#allocation3 + $0x28] sm:$0xff]  ;;  %v57_v27 = vld [vmem:[#allocation3 + $0x78] sm:$0xff]  ;;  %vm561_vm6 = vcmask 523712   ;;  %vm568_vm7 = vcmask 589312   ;;  %vm575_vm8 = vcmask 654912  }
  0x20   :  { %v142_v2 = vsub.s32 0, %v820_v1  ;;  %v146_v3 = vsub.s32 1, %v820_v1  ;;  %v150_v4 = vsub.s32 2, %v820_v1  ;;  %v154_v5 = vsub.s32 3, %v820_v1  ;;  %v48_v28 = vld [vmem:[#allocation3 + $0x30] sm:$0xff]  ;;  %v49_v29 = vld [vmem:[#allocation3 + $0x38] sm:$0xff] }
  0x21   :  { %v158_v6 = vsub.s32 4, %v820_v1  ;;  %v162_v7 = vsub.s32 5, %v820_v1  ;;  %v58_v31 = vld [vmem:[#allocation3 + $0x80] sm:$0xff]  ;;  %v59_v32 = vld [vmem:[#allocation3 + $0x88] sm:$0xff]  ;;  %v60_v41 = vld [vmem:[#allocation3 + $0x90] sm:$0xff]  ;;  %vm582_vm9 = vcmask 720512  }
  0x22   :  { %v828_v13 = vrot.slane %v138_v11, %v142_v2  ;;  %v830_v14 = vrot.slane %v138_v11, %v146_v3  ;;  %v832_v15 = vrot.slane %v138_v11, %v150_v4  ;;  %v834_v16 = vrot.slane %v138_v11, %v154_v5  ;;  %v50_v35 = vld [vmem:[#allocation3 + $0x40] sm:$0xff]  ;;  %v51_v40 = vld [vmem:[#allocation3 + $0x48] sm:$0xff]  ;;  %v52_v44 = vld [vmem:[#allocation3 + $0x50] sm:$0xff] }
  0x23   :  { %v836_v21 = vrot.slane %v138_v11, %v158_v6  ;;  %v838_v22 = vrot.slane %v138_v11, %v162_v7  ;;  %v61_v47 = vld [vmem:[#allocation3 + $0x98] sm:$0xff]  ;;  %v62_v48 = vld [vmem:[#allocation3 + $0xa0] sm:$0xff]  ;;  %v63_v54 = vld [vmem:[#allocation3 + $0xa8] sm:$0xff]  ;;  %vm589_vm10 = vcmask 786112   ;;  %vm596_vm11 = vcmask 851712  }
  0x24   :  { %v170_v24 = vmul.f32 %v828_v13, %v42_v8  ;;  %v171_v25 = vmul.f32 %v830_v14, %v43_v9  ;;  %v172_v26 = vmul.f32 %v832_v15, %v44_v10  ;;  %v173_v30 = vmul.f32 %v834_v16, %v45_v12  ;;  %v53_v52 = vld [vmem:[#allocation3 + $0x58] sm:$0xff]  ;;  %v66_v59 = vld [vmem:[#allocation3 + $0xc0] sm:$0xff]  ;;  %v67_v60 = vld [vmem:[#allocation3 + $0xc8] sm:$0xff] }
  0x25   :  { %v182_v33 = vmul.f32 %v828_v13, %v54_v17  ;;  %v183_v34 = vmul.f32 %v830_v14, %v55_v18  ;;  %v174_v36 = vmul.f32 %v836_v21, %v46_v19  ;;  %v175_v37 = vmul.f32 %v838_v22, %v47_v20  ;;  %v64_v63 = vld [vmem:[#allocation3 + $0xb0] sm:$0xff]  ;;  %v65_v8 = vld [vmem:[#allocation3 + $0xb8] sm:$0xff] }
  0x26   :  { %v266_v38 = vadd.f32 %v171_v25, %v170_v24  ;;  %v184_v39 = vmul.f32 %v832_v15, %v56_v23  ;;  %v185_v42 = vmul.f32 %v834_v16, %v57_v27  ;;  %v176_v45 = vmul.f32 %v828_v13, %v48_v28  ;;  %v68_v4 = vld [vmem:[#allocation3 + $0xd0] sm:$0xff]  ;;  %v69_v10 = vld [vmem:[#allocation3 + $0xd8] sm:$0xff]  ;;  %v70_v25 = vld [vmem:[#allocation3 + $0xe0] sm:$0xff] }
  0x27   :  { %v280_v43 = vadd.f32 %v183_v34, %v182_v33  ;;  %v177_v46 = vmul.f32 %v830_v14, %v49_v29  ;;  %v186_v50 = vmul.f32 %v836_v21, %v58_v31  ;;  %v187_v51 = vmul.f32 %v838_v22, %v59_v32  ;;  %v72_v19 = vld [vmem:[#allocation3 + $0xf0] sm:$0xff]  ;;  %v73_v27 = vld [vmem:[#allocation3 + $0xf8] sm:$0xff]  ;;  %v74_v28 = vld [vmem:[#allocation3 + $0x100] sm:$0xff] }
  0x28   :  { %v267_v49 = vadd.f32 %v266_v38, %v172_v26  ;;  %v178_v53 = vmul.f32 %v832_v15, %v50_v35  ;;  %v179_v56 = vmul.f32 %v834_v16, %v51_v40  ;;  %v188_v58 = vmul.f32 %v828_v13, %v60_v41  ;;  %v71_v32 = vld [vmem:[#allocation3 + $0xe8] sm:$0xff]  ;;  %v78_v40 = vld [vmem:[#allocation3 + $0x120] sm:$0xff] }
  0x29   :  { %v281_v55 = vadd.f32 %v280_v43, %v184_v39  ;;  %v273_v57 = vadd.f32 %v177_v46, %v176_v45  ;;  %v180_v62 = vmul.f32 %v836_v21, %v52_v44  ;;  %v189_v2 = vmul.f32 %v830_v14, %v61_v47  ;;  %v75_v34 = vld [vmem:[#allocation3 + $0x108] sm:$0xff]  ;;  %v76_v44 = vld [vmem:[#allocation3 + $0x110] sm:$0xff] }
  0x2a   :  { %v268_v61 = vadd.f32 %v267_v49, %v173_v30  ;;  %v190_v3 = vmul.f32 %v832_v15, %v62_v48  ;;  %v181_v6 = vmul.f32 %v838_v22, %v53_v52  ;;  %v191_v9 = vmul.f32 %v834_v16, %v63_v54  ;;  %v79_v41 = vld [vmem:[#allocation3 + $0x128] sm:$0xff]  ;;  %v80_v47 = vld [vmem:[#allocation3 + $0x130] sm:$0xff]  ;;  %v81_v52 = vld [vmem:[#allocation3 + $0x138] sm:$0xff] }
  0x2b   :  { %v282_v5 = vadd.f32 %v281_v55, %v185_v42  ;;  %v274_v7 = vadd.f32 %v273_v57, %v178_v53  ;;  %v287_v12 = vadd.f32 %v189_v2, %v188_v58  ;;  %v194_v17 = vmul.f32 %v828_v13, %v66_v59  ;;  %v84_v57 = vld [vmem:[#allocation3 + $0x150] sm:$0xff]  ;;  %v85_v58 = vld [vmem:[#allocation3 + $0x158] sm:$0xff]  ;;  %v86_v59 = vld [vmem:[#allocation3 + $0x160] sm:$0xff] }
  0x2c   :  { %v269_v11 = vadd.f32 %v268_v61, %v174_v36  ;;  %v195_v18 = vmul.f32 %v830_v14, %v67_v60  ;;  %v192_v24 = vmul.f32 %v836_v21, %v64_v63  ;;  %v196_v26 = vmul.f32 %v832_v15, %v68_v4  ;;  %v82_v63 = vld [vmem:[#allocation3 + $0x140] sm:$0xff]  ;;  %v83_v2 = vld [vmem:[#allocation3 + $0x148] sm:$0xff] }
  0x2d   :  { %v283_v20 = vadd.f32 %v282_v5, %v186_v50  ;;  %v275_v23 = vadd.f32 %v274_v7, %v179_v56  ;;  %v193_v30 = vmul.f32 %v838_v22, %v65_v8  ;;  %v288_v31 = vadd.f32 %v287_v12, %v190_v3  ;;  %v87_v8 = vld [vmem:[#allocation3 + $0x168] sm:$0xff] }
  0x2e   :  { %v270_v29 = vadd.f32 %v269_v11, %v175_v37  ;;  %v197_v33 = vmul.f32 %v834_v16, %v69_v10  ;;  %v294_v38 = vadd.f32 %v195_v18, %v194_v17  ;;  %v200_v39 = vmul.f32 %v828_v13, %v72_v19  ;;  %v77_v37 = vld [vmem:[#allocation3 + $0x118] sm:$0xff]  ;;  %v91_v18 = vld [vmem:[#allocation3 + $0x188] sm:$0xff]  ;;  %v92_v19 = vld [vmem:[#allocation3 + $0x190] sm:$0xff] }
  0x2f   :  { %v284_v35 = vadd.f32 %v283_v20, %v187_v51  ;;  %v276_v36 = vadd.f32 %v275_v23, %v180_v62  ;;  %v289_v42 = vadd.f32 %v288_v31, %v191_v9  ;;  %v198_v43 = vmul.f32 %v836_v21, %v70_v25  ;;  %v90_v9 = vld [vmem:[#allocation3 + $0x180] sm:$0xff] }
  0x30   :  { %271 = vadd.xlane.f32.xlu0 %v270_v29  ;;  %v201_v45 = vmul.f32 %v830_v14, %v73_v27  ;;  %v202_v46 = vmul.f32 %v832_v15, %v74_v28  ;;  %v199_v49 = vmul.f32 %v838_v22, %v71_v32  ;;  %v295_v50 = vadd.f32 %v294_v38, %v196_v26  ;;  %v88_v26 = vld [vmem:[#allocation3 + $0x170] sm:$0xff]  ;;  %v89_v27 = vld [vmem:[#allocation3 + $0x178] sm:$0xff] }
  0x31   :  { %285 = vadd.xlane.f32.xlu1 %v284_v35  ;;  %v277_v48 = vadd.f32 %v276_v36, %v181_v6  ;;  %v203_v51 = vmul.f32 %v834_v16, %v75_v34  ;;  %v290_v53 = vadd.f32 %v289_v42, %v192_v24  ;;  %v206_v55 = vmul.f32 %v828_v13, %v78_v40  ;;  %v93_v28 = vld [vmem:[#allocation3 + $0x198] sm:$0xff]  ;;  %v94_v36 = vld [vmem:[#allocation3 + $0x1a0] sm:$0xff] }
  0x32   :  { %v301_v54 = vadd.f32 %v201_v45, %v200_v39  ;;  %v207_v56 = vmul.f32 %v830_v14, %v79_v41  ;;  %v296_v60 = vadd.f32 %v295_v50, %v197_v33  ;;  %v204_v61 = vmul.f32 %v836_v21, %v76_v44  ;;  %v96_v33 = vld [vmem:[#allocation3 + $0x1b0] sm:$0xff]  ;;  %v97_v40 = vld [vmem:[#allocation3 + $0x1b8] sm:$0xff]  ;;  %v98_v41 = vld [vmem:[#allocation3 + $0x1c0] sm:$0xff] }
  0x33   :  { %v205_v62 = vmul.f32 %v838_v22, %v77_v37  ;;  %v208_v3 = vmul.f32 %v832_v15, %v80_v47  ;;  %v291_v4 = vadd.f32 %v290_v53, %v193_v30  ;;  %v209_v6 = vmul.f32 %v834_v16, %v81_v52  ;;  %v95_v37 = vld [vmem:[#allocation3 + $0x1a8] sm:$0xff] }
  0x34   :  { %278 = vadd.xlane.f32.xlu0 %v277_v48  ;;  %v302_v5 = vadd.f32 %v301_v54, %v202_v46  ;;  %v308_v7 = vadd.f32 %v207_v56, %v206_v55  ;;  %v297_v10 = vadd.f32 %v296_v60, %v198_v43  ;;  %v212_v11 = vmul.f32 %v828_v13, %v84_v57  ;;  %v99_v46 = vld [vmem:[#allocation3 + $0x1c8] sm:$0xff]  ;;  %v100_v55 = vld [vmem:[#allocation3 + $0x1d0] sm:$0xff]  ;;  %v101_v56 = vld [vmem:[#allocation3 + $0x1d8] sm:$0xff] }
  0x35   :  { %v213_v12 = vmul.f32 %v830_v14, %v85_v58  ;;  %v214_v17 = vmul.f32 %v832_v15, %v86_v59  ;;  %292 = vadd.xlane.f32.xlu1 %v291_v4  ;;  %v210_v23 = vmul.f32 %v836_v21, %v82_v63  ;;  %v211_v24 = vmul.f32 %v838_v22, %v83_v2  ;;  %v103_v52 = vld [vmem:[#allocation3 + $0x1e8] sm:$0xff]  ;;  %v104_v59 = vld [vmem:[#allocation3 + $0x1f0] sm:$0xff]  ;;  %v105_v2 = vld [vmem:[#allocation3 + $0x1f8] sm:$0xff] }
  0x36   :  { %v303_v20 = vadd.f32 %v302_v5, %v203_v51  ;;  %v309_v25 = vadd.f32 %v308_v7, %v208_v3  ;;  %v298_v29 = vadd.f32 %v297_v10, %v199_v49  ;;  %v215_v30 = vmul.f32 %v834_v16, %v87_v8  ;;  %v102_v51 = vld [vmem:[#allocation3 + $0x1e0] sm:$0xff]  ;;  %v108_v7 = vld [vmem:[#allocation3 + $0x210] sm:$0xff]  ;;  %v109_v8 = vld [vmem:[#allocation3 + $0x218] sm:$0xff] }
  0x37   :  { %v315_v31 = vadd.f32 %v213_v12, %v212_v11  ;;  %v218_v32 = vmul.f32 %v828_v13, %v90_v9  ;;  %v219_v38 = vmul.f32 %v830_v14, %v91_v18  ;;  %v220_v39 = vmul.f32 %v832_v15, %v92_v19  ;;  %v110_v9 = vld [vmem:[#allocation3 + $0x220] sm:$0xff]  ;;  %v107_v18 = vld [vmem:[#allocation3 + $0x208] sm:$0xff] }
  0x38   :  { %v304_v34 = vadd.f32 %v303_v20, %v204_v61  ;;  %v310_v35 = vadd.f32 %v309_v25, %v209_v6  ;;  %299 = vadd.xlane.f32.xlu0 %v298_v29  ;;  %v216_v42 = vmul.f32 %v836_v21, %v88_v26  ;;  %v217_v43 = vmul.f32 %v838_v22, %v89_v27  ;;  %v111_v26 = vld [vmem:[#allocation3 + $0x228] sm:$0xff]  ;;  %v114_v27 = vld [vmem:[#allocation3 + $0x240] sm:$0xff] }
  0x39   :  { %v316_v44 = vadd.f32 %v315_v31, %v214_v17  ;;  %v221_v45 = vmul.f32 %v834_v16, %v93_v28  ;;  %v322_v49 = vadd.f32 %v219_v38, %v218_v32  ;;  %v224_v50 = vmul.f32 %v828_v13, %v96_v33  ;;  %v106_v17 = vld [vmem:[#allocation3 + $0x200] sm:$0xff]  ;;  %v115_v32 = vld [vmem:[#allocation3 + $0x248] sm:$0xff]  ;;  %v116_v33 = vld [vmem:[#allocation3 + $0x250] sm:$0xff] }
  0x3a   :  { %v305_v47 = vadd.f32 %v304_v34, %v205_v62  ;;  %v311_v48 = vadd.f32 %v310_v35, %v210_v23  ;;  %v222_v54 = vmul.f32 %v836_v21, %v94_v36  ;;  %v225_v57 = vmul.f32 %v830_v14, %v97_v40  ;;  %v117_v40 = vld [vmem:[#allocation3 + $0x258] sm:$0xff] }
  0x3b   :  { %v317_v53 = vadd.f32 %v316_v44, %v215_v30  ;;  %v226_v58 = vmul.f32 %v832_v15, %v98_v41  ;;  %v223_v61 = vmul.f32 %v838_v22, %v95_v37  ;;  %v323_v62 = vadd.f32 %v322_v49, %v220_v39  ;;  %v112_v39 = vld [vmem:[#allocation3 + $0x230] sm:$0xff] }
  0x3c   :  { %306 = vadd.xlane.f32.xlu1 %v305_v47  ;;  %v312_v60 = vadd.f32 %v311_v48, %v211_v24  ;;  %v227_v63 = vmul.f32 %v834_v16, %v99_v46  ;;  %v329_v4 = vadd.f32 %v225_v57, %v224_v50  ;;  %v230_v5 = vmul.f32 %v828_v13, %v102_v51  ;;  %v120_v37 = vld [vmem:[#allocation3 + $0x270] sm:$0xff]  ;;  %v113_v47 = vld [vmem:[#allocation3 + $0x238] sm:$0xff]  ;;  %v122_v51 = vld [vmem:[#allocation3 + $0x280] sm:$0xff] }
  0x3d   :  { %v318_v3 = vadd.f32 %v317_v53, %v216_v42  ;;  %v231_v6 = vmul.f32 %v830_v14, %v103_v52  ;;  %v324_v10 = vadd.f32 %v323_v62, %v221_v45  ;;  %v228_v11 = vmul.f32 %v836_v21, %v100_v55  ;;  %v121_v50 = vld [vmem:[#allocation3 + $0x278] sm:$0xff]  ;;  %v127_v62 = vld [vmem:[#allocation3 + $0x2a8] sm:$0xff] }
  0x3e   :  { %313 = vadd.xlane.f32.xlu0 %v312_v60  ;;  %v229_v12 = vmul.f32 %v838_v22, %v101_v56  ;;  %v232_v19 = vmul.f32 %v832_v15, %v104_v59  ;;  %v330_v23 = vadd.f32 %v329_v4, %v226_v58  ;;  %v233_v24 = vmul.f32 %v834_v16, %v105_v2  ;;  %v123_v56 = vld [vmem:[#allocation3 + $0x288] sm:$0xff]  ;;  %v124_v4 = vld [vmem:[#allocation3 + $0x290] sm:$0xff] }
  0x3f   :  { %v319_v20 = vadd.f32 %v318_v3, %v217_v43  ;;  %v336_v25 = vadd.f32 %v231_v6, %v230_v5  ;;  %v325_v28 = vadd.f32 %v324_v10, %v222_v54  ;;  %v236_v29 = vmul.f32 %v828_v13, %v108_v7  ;;  %v118_v54 = vld [vmem:[#allocation3 + $0x260] sm:$0xff]  ;;  %v119_v3 = vld [vmem:[#allocation3 + $0x268] sm:$0xff]  ;;  %v128_v7 = vld [vmem:[#allocation3 + $0x2b0] sm:$0xff] }
  0x40   :  { %v237_v30 = vmul.f32 %v830_v14, %v109_v8  ;;  %v238_v31 = vmul.f32 %v832_v15, %v110_v9  ;;  %v331_v34 = vadd.f32 %v330_v23, %v227_v63  ;;  %v234_v35 = vmul.f32 %v836_v21, %v106_v17  ;;  %v132_v23 = vld [vmem:[#allocation3 + $0x2d0] sm:$0xff] }
  0x41   :  { %320 = vadd.xlane.f32.xlu1 %v319_v20  ;;  %v235_v36 = vmul.f32 %v838_v22, %v107_v18  ;;  %v337_v38 = vadd.f32 %v336_v25, %v232_v19  ;;  %v326_v41 = vadd.f32 %v325_v28, %v223_v61  ;;  %v239_v42 = vmul.f32 %v834_v16, %v111_v26  ;;  %v126_v61 = vld [vmem:[#allocation3 + $0x2a0] sm:$0xff]  ;;  %v125_v28 = vld [vmem:[#allocation3 + $0x298] sm:$0xff] }
  0x42   :  { %v343_v43 = vadd.f32 %v237_v30, %v236_v29  ;;  %v242_v44 = vmul.f32 %v828_v13, %v114_v27  ;;  %v332_v45 = vadd.f32 %v331_v34, %v228_v11  ;;  %v243_v48 = vmul.f32 %v830_v14, %v115_v32  ;;  %v134_v25 = vld [vmem:[#allocation3 + $0x2e0] sm:$0xff] }
  0x43   :  { %v338_v46 = vadd.f32 %v337_v38, %v233_v24  ;;  %v244_v49 = vmul.f32 %v832_v15, %v116_v33  ;;  %327 = vadd.xlane.f32.xlu0 %v326_v41  ;;  %v240_v52 = vmul.f32 %v836_v21, %v112_v39  ;;  %v245_v55 = vmul.f32 %v834_v16, %v117_v40  ;;  %v133_v24 = vld [vmem:[#allocation3 + $0x2d8] sm:$0xff]  ;;  %v130_v30 = vld [vmem:[#allocation3 + $0x2c0] sm:$0xff]  ;;  %v131_v39 = vld [vmem:[#allocation3 + $0x2c8] sm:$0xff] }
  0x44   :  { %v344_v53 = vadd.f32 %v343_v43, %v238_v31  ;;  %v333_v57 = vadd.f32 %v332_v45, %v229_v12  ;;  %v350_v59 = vadd.f32 %v243_v48, %v242_v44  ;;  %v248_v60 = vmul.f32 %v828_v13, %v120_v37  ;;  %v129_v12 = vld [vmem:[#allocation3 + $0x2b8] sm:$0xff] }
  0x45   :  { %v339_v58 = vadd.f32 %v338_v46, %v234_v35  ;;  %v241_v63 = vmul.f32 %v838_v22, %v113_v47  ;;  %v249_v5 = vmul.f32 %v830_v14, %v121_v50  ;;  %v250_v6 = vmul.f32 %v832_v15, %v122_v51  ;;  %v136_v46 = vld [vmem:[#allocation3 + $0x2f0] sm:$0xff] }
  0x46   :  { %v345_v2 = vadd.f32 %v344_v53, %v239_v42  ;;  %334 = vadd.xlane.f32.xlu1 %v333_v57  ;;  %v246_v9 = vmul.f32 %v836_v21, %v118_v54  ;;  %v351_v10 = vadd.f32 %v350_v59, %v244_v49  ;;  %v251_v11 = vmul.f32 %v834_v16, %v123_v56 }
  0x47   :  { %v340_v8 = vadd.f32 %v339_v58, %v235_v36  ;;  %v357_v18 = vadd.f32 %v249_v5, %v248_v60  ;;  %v254_v19 = vmul.f32 %v828_v13, %v126_v61  ;;  %v255_v20 = vmul.f32 %v830_v14, %v127_v62  ;;  %v135_v36 = vld [vmem:[#allocation3 + $0x2e8] sm:$0xff] }
  0x48   :  { %v346_v17 = vadd.f32 %v345_v2, %v240_v52  ;;  %v247_v26 = vmul.f32 %v838_v22, %v119_v3  ;;  %v352_v27 = vadd.f32 %v351_v10, %v245_v55  ;;  %v252_v29 = vmul.f32 %v836_v21, %v124_v4  ;;  %v137_v52 = vld [vmem:[#allocation3 + $0x2f8] sm:$0xff] }
  0x49   :  { %341 = vadd.xlane.f32.xlu0 %v340_v8  ;;  %v256_v31 = vmul.f32 %v832_v15, %v128_v7  ;;  %v358_v33 = vadd.f32 %v357_v18, %v250_v6  ;;  %v257_v34 = vmul.f32 %v834_v16, %v129_v12  ;;  %v364_v35 = vadd.f32 %v255_v20, %v254_v19 }
  0x4a   :  { %v347_v32 = vadd.f32 %v346_v17, %v241_v63  ;;  %v353_v38 = vadd.f32 %v352_v27, %v246_v9  ;;  %v260_v40 = vmul.f32 %v828_v13, %v132_v23  ;;  %v261_v41 = vmul.f32 %v830_v14, %v133_v24 }
  0x4b   :  { %v262_v42 = vmul.f32 %v832_v15, %v134_v25  ;;  %v253_v43 = vmul.f32 %v838_v22, %v125_v28  ;;  %v359_v44 = vadd.f32 %v358_v33, %v251_v11  ;;  %v258_v37 = vmul.f32 %v836_v21, %v130_v30 }
  0x4c   :  { %348 = vadd.xlane.f32.xlu1 %v347_v32  ;;  %v365_v45 = vadd.f32 %v364_v35, %v256_v31  ;;  %v354_v47 = vadd.f32 %v353_v38, %v247_v26  ;;  %v263_v48 = vmul.f32 %v834_v16, %v135_v36  ;;  %v371_v49 = vadd.f32 %v261_v41, %v260_v40 }
  0x4d   :  { %v360_v50 = vadd.f32 %v359_v44, %v252_v29  ;;  %v259_v51 = vmul.f32 %v838_v22, %v131_v39  ;;  %v264_v14 = vmul.f32 %v836_v21, %v136_v46  ;;  %v265_v55 = vmul.f32 %v838_v22, %v137_v52 }
  0x4e   :  { %v366_v13 = vadd.f32 %v365_v45, %v257_v34  ;;  %355 = vadd.xlane.f32.xlu0 %v354_v47  ;;  %v372_v15 = vadd.f32 %v371_v49, %v262_v42  ;;  %v939_v59 = vstv %s999_s2  ;;  %vm603_vm12 = vcmask 917312   ;;  %s792_s2 = smov [#allocation8]  }
  0x4f   :  { %v361_v53 = vadd.f32 %v360_v50, %v253_v43  ;;  %vm610_vm13 = vcmask 982912   ;;  %s627_s24 = sshll.u32 %s792_s2, 4  ;;  %vm617_vm14 = vcmask 1048512   ;;  %s628_s24 = int_to_ptr.vmem [resolvable:$true] %s627_s24 }
  0x50   :  { %v367_v54 = vadd.f32 %v366_v13, %v258_v37  ;;  %v373_v56 = vadd.f32 %v372_v15, %v263_v48  ;;  %v954_v48 = vand.u32 127, %v140_v0  ;;  %s762_s25 = scalar_lea.vmem %s628_s24, 16  ;;  %s766_s26 = scalar_lea.vmem %s628_s24, 32 }
  0x51   :  { %362 = vadd.xlane.f32.xlu1 %v361_v53  ;;  %p763_p10 = scmp.ne.s32.totalorder %s628_s24, %s762_s25  ;;  %p767_p11 = scmp.lt.s32.totalorder %s628_s24, %s628_s24 }
  0x52   :  { %v368_v57 = vadd.f32 %v367_v54, %v259_v51  ;;  %v374_v58 = vadd.f32 %v373_v56, %v264_v14  ;;  %v514_v13 = vadd.s32 4294967288, %v954_v48  ;;  %v521_v0 = vadd.s32 4294967280, %v954_v48  ;;  %p768_p12 = scmp.lt.s32.totalorder %s766_s26, %s762_s25 }
  0x54   :  { %369 = vadd.xlane.f32.xlu0 %v368_v57  ;;  %v375_v16 = vadd.f32 %v374_v58, %v265_v55  ;;  %v517_v57 = vsub.s32 %v514_v13, %v820_v1  ;;  %p769_p13 = por %p768_p12, %p767_p11 }
  0x56   :  { %376 = vadd.xlane.f32.xlu1 %v375_v16  ;;  %p770_p0 = pnand %p769_p13, %p763_p10 }
  0xb9   :  { %v272_v60 = vpop.xlane.xlu0 %271 }
  0xba   :  { %v380_v21 = vadd.f32 %v939_v59, %v272_v60  ;;  %v286_v61 = vpop.xlane.xlu1 %285 }
  0xbb   :  { %v382_v62 = vadd.f32 %v939_v59, %v286_v61 }
  0xbc   :  { %v637_v63 = vmul.f32 -1.442695, %v380_v21 }
  0xbd   :  { %v639_v22 = vmul.f32 -1.442695, %v382_v62  ;;  %v279_v2 = vpop.xlane.xlu0 %278 }
  0xbe   :  { %v381_v3 = vadd.f32 %v939_v59, %v279_v2  ;;  %v293_v4 = vpop.xlane.xlu1 %292  ;;  %658 = vpow2.f32 %v637_v63  ;;  %v512_v63 = vsub.s32 %v954_v48, %v820_v1 }
  0xbf   :  { %v383_v6 = vadd.f32 %v939_v59, %v293_v4  ;;  %660 = vpow2.f32 %v639_v22  ;;  %v528_v22 = vadd.s32 4294967272, %v954_v48 }
  0xc0   :  { %v638_v5 = vmul.f32 -1.442695, %v381_v3 }
  0xc1   :  { %v640_v7 = vmul.f32 -1.442695, %v383_v6  ;;  %v300_v8 = vpop.xlane.xlu0 %299 }
  0xc2   :  { %662 = vpow2.f32 %v638_v5  ;;  %v384_v9 = vadd.f32 %v939_v59, %v300_v8  ;;  %v524_v8 = vsub.s32 %v521_v0, %v820_v1 }
  0xc3   :  { %664 = vpow2.f32 %v640_v7 }
  0xc4   :  { %v641_v10 = vmul.f32 -1.442695, %v384_v9 }
  0xc5   :  { %v307_v11 = vpop.xlane.xlu1 %306 }
  0xc6   :  { %v385_v12 = vadd.f32 %v939_v59, %v307_v11  ;;  %666 = vpow2.f32 %v641_v10  ;;  %v535_v11 = vadd.s32 4294967264, %v954_v48 }
  0xc7   :  { %v314_v17 = vpop.xlane.xlu0 %313 }
  0xc8   :  { %v642_v18 = vmul.f32 -1.442695, %v385_v12  ;;  %v386_v19 = vadd.f32 %v939_v59, %v314_v17 }
  0xca   :  { %668 = vpow2.f32 %v642_v18  ;;  %v643_v20 = vmul.f32 -1.442695, %v386_v19  ;;  %v321_v23 = vpop.xlane.xlu1 %320 }
  0xcb   :  { %v387_v24 = vadd.f32 %v939_v59, %v321_v23  ;;  %v659_v25 = vpop.eup %658 }
  0xcc   :  { %670 = vpow2.f32 %v643_v20  ;;  %v328_v27 = vpop.xlane.xlu0 %327  ;;  %v661_v28 = vpop.eup %660  ;;  %v444_v31 = vadd.f32 1.0, %v659_v25  ;;  %v531_v20 = vsub.s32 %v528_v22, %v820_v1 }
  0xcd   :  { %v644_v26 = vmul.f32 -1.442695, %v387_v24  ;;  %v388_v29 = vadd.f32 %v939_v59, %v328_v27  ;;  %v446_v38 = vadd.f32 1.0, %v661_v28  ;;  %v542_v24 = vadd.s32 4294967256, %v954_v48 }
  0xce   :  { %v538_v28 = vsub.s32 %v535_v11, %v820_v1 }
  0xcf   :  { %v663_v30 = vpop.eup %662  ;;  %672 = vpow2.f32 %v644_v26  ;;  %v645_v33 = vmul.f32 -1.442695, %v388_v29  ;;  %v335_v34 = vpop.xlane.xlu1 %334  ;;  %v549_v29 = vadd.s32 4294967248, %v954_v48 }
  0xd0   :  { %v445_v32 = vadd.f32 1.0, %v663_v30  ;;  %v665_v35 = vpop.eup %664  ;;  %v389_v36 = vadd.f32 %v939_v59, %v335_v34 }
  0xd1   :  { %v447_v40 = vadd.f32 1.0, %v665_v35  ;;  %v545_v35 = vsub.s32 %v542_v24, %v820_v1 }
  0xd2   :  { %674 = vrcp.f32 %v445_v32  ;;  %v342_v39 = vpop.xlane.xlu0 %341  ;;  %v646_v41 = vmul.f32 -1.442695, %v389_v36  ;;  %v556_v36 = vadd.s32 4294967240, %v954_v48 }
  0xd3   :  { %676 = vpow2.f32 %v645_v33  ;;  %v390_v42 = vadd.f32 %v939_v59, %v342_v39  ;;  %v667_v43 = vpop.eup %666 }
  0xd4   :  { %678 = vrcp.f32 %v444_v31  ;;  %v448_v45 = vadd.f32 1.0, %v667_v43 }
  0xd5   :  { %680 = vpow2.f32 %v646_v41  ;;  %v647_v44 = vmul.f32 -1.442695, %v390_v42  ;;  %v349_v37 = vpop.xlane.xlu1 %348  ;;  %v552_v41 = vsub.s32 %v549_v29, %v820_v1 }
  0xd6   :  { %682 = vrcp.f32 %v446_v38  ;;  %v391_v46 = vadd.f32 %v939_v59, %v349_v37  ;;  %v563_v38 = vadd.s32 4294967232, %v954_v48 }
  0xd7   :  { %v669_v47 = vpop.eup %668  ;;  %684 = vrcp.f32 %v447_v40  ;;  %v356_v50 = vpop.xlane.xlu0 %355 }
  0xd8   :  { %686 = vpow2.f32 %v647_v44  ;;  %v648_v49 = vmul.f32 -1.442695, %v391_v46  ;;  %v392_v52 = vadd.f32 %v939_v59, %v356_v50  ;;  %v449_v14 = vadd.f32 1.0, %v669_v47 }
  0xd9   :  { %v671_v51 = vpop.eup %670  ;;  %688 = vrcp.f32 %v448_v45  ;;  %v570_v45 = vadd.s32 4294967224, %v954_v48  ;;  %v566_v50 = vsub.s32 %v563_v38, %v820_v1 }
  0xda   :  { %v450_v15 = vadd.f32 1.0, %v671_v51  ;;  %690 = vpow2.f32 %v648_v49  ;;  %v649_v53 = vmul.f32 -1.442695, %v392_v52  ;;  %v363_v54 = vpop.xlane.xlu1 %362  ;;  %v559_v49 = vsub.s32 %v556_v36, %v820_v1 }
  0xdb   :  { %v393_v55 = vadd.f32 %v939_v59, %v363_v54 }
  0xdc   :  { %v673_v56 = vpop.eup %672  ;;  %692 = vpow2.f32 %v649_v53 }
  0xdd   :  { %v370_v58 = vpop.xlane.xlu0 %369  ;;  %694 = vrcp.f32 %v449_v14  ;;  %v451_v16 = vadd.f32 1.0, %v673_v56  ;;  %v650_v60 = vmul.f32 -1.442695, %v393_v55  ;;  %v573_v55 = vsub.s32 %v570_v45, %v820_v1 }
  0xde   :  { %v394_v21 = vadd.f32 %v939_v59, %v370_v58  ;;  %696 = vrcp.f32 %v450_v15  ;;  %v577_v15 = vadd.s32 4294967216, %v954_v48  ;;  %v584_v58 = vadd.s32 4294967208, %v954_v48 }
  0xdf   :  { %v675_v61 = vpop.eup %674  ;;  %698 = vrcp.f32 %v451_v16  ;;  %v377_v3 = vpop.xlane.xlu1 %376 }
  0xe0   :  { %v677_v62 = vpop.eup %676  ;;  %v651_v2 = vmul.f32 -1.442695, %v394_v21  ;;  %700 = vpow2.f32 %v650_v60  ;;  %v395_v6 = vadd.f32 %v939_v59, %v377_v3  ;;  %v518_v9 = vrot.slane %v675_v61, %v517_v57 }
  0xe1   :  { %v679_v4 = vpop.eup %678  ;;  %v452_v5 = vadd.f32 1.0, %v677_v62  ;;  %v580_v61 = vsub.s32 %v577_v15, %v820_v1  ;;  %v591_v62 = vadd.s32 4294967200, %v954_v48 }
  0xe2   :  { %v681_v7 = vpop.eup %680  ;;  %702 = vpow2.f32 %v651_v2  ;;  %v652_v17 = vmul.f32 -1.442695, %v395_v6  ;;  %v513_v19 = vrot.slane %v679_v4, %v512_v63  ;;  %v587_v4 = vsub.s32 %v584_v58, %v820_v1 }
  0xe3   :  { %v683_v10 = vpop.eup %682  ;;  %704 = vrcp.f32 %v452_v5  ;;  %v453_v12 = vadd.f32 1.0, %v681_v7  ;;  %v594_v7 = vsub.s32 %v591_v62, %v820_v1 }
  0xe4   :  { %v685_v18 = vpop.eup %684  ;;  %v520_v59 = vsel %vm519_vm0, %v518_v9, %v513_v19  ;;  %v525_v27 = vrot.slane %v683_v10, %v524_v8  ;;  %v598_v8 = vadd.s32 4294967192, %v954_v48  ;;  %v605_v10 = vadd.s32 4294967184, %v954_v48 }
  0xe5   :  { %v687_v23 = vpop.eup %686  ;;  %706 = vrcp.f32 %v453_v12  ;;  %v532_v31 = vrot.slane %v685_v18, %v531_v20 }
  0xe6   :  { %v454_v25 = vadd.f32 1.0, %v687_v23  ;;  %708 = vpow2.f32 %v652_v17  ;;  %v689_v26 = vpop.eup %688  ;;  %v527_v32 = vsel %vm526_vm1, %v525_v27, %v520_v59  ;;  %v601_v20 = vsub.s32 %v598_v8, %v820_v1 }
  0xe7   :  { %v691_v30 = vpop.eup %690  ;;  %v539_v40 = vrot.slane %v689_v26, %v538_v28  ;;  %v534_v44 = vsel %vm533_vm2, %v532_v31, %v527_v32  ;;  %v608_v23 = vsub.s32 %v605_v10, %v820_v1  ;;  %v612_v59 = vadd.s32 4294967176, %v954_v48 }
  0xe8   :  { %710 = vrcp.f32 %v454_v25  ;;  %v455_v33 = vadd.f32 1.0, %v691_v30 }
  0xe9   :  { %v693_v34 = vpop.eup %692  ;;  %v541_v13 = vsel %vm540_vm3, %v539_v40, %v534_v44  ;;  %v615_v30 = vsub.s32 %v612_v59, %v820_v1 }
  0xea   :  { %v695_v39 = vpop.eup %694  ;;  %712 = vrcp.f32 %v455_v33  ;;  %v456_v42 = vadd.f32 1.0, %v693_v34 }
  0xeb   :  { %v697_v43 = vpop.eup %696  ;;  %v546_v47 = vrot.slane %v695_v39, %v545_v35 }
  0xec   :  { %v699_v37 = vpop.eup %698  ;;  %714 = vrcp.f32 %v456_v42  ;;  %v553_v52 = vrot.slane %v697_v43, %v552_v41 }
  0xed   :  { %v701_v46 = vpop.eup %700  ;;  %v548_v0 = vsel %vm547_vm4, %v546_v47, %v541_v13  ;;  %v560_v57 = vrot.slane %v699_v37, %v559_v49 }
  0xee   :  { %v457_v14 = vadd.f32 1.0, %v701_v46  ;;  %v555_v21 = vsel %vm554_vm5, %v553_v52, %v548_v0 }
  0xef   :  { %v703_v51 = vpop.eup %702  ;;  %v562_v3 = vsel %vm561_vm6, %v560_v57, %v555_v21 }
  0xf0   :  { %v705_v53 = vpop.eup %704  ;;  %v458_v54 = vadd.f32 1.0, %v703_v51  ;;  %716 = vrcp.f32 %v457_v14 }
  0xf1   :  { %v567_v60 = vrot.slane %v705_v53, %v566_v50 }
  0xf2   :  { %v707_v56 = vpop.eup %706  ;;  %718 = vrcp.f32 %v458_v54 }
  0xf3   :  { %v709_v16 = vpop.eup %708  ;;  %v574_v2 = vrot.slane %v707_v56, %v573_v55  ;;  %v569_v5 = vsel %vm568_vm7, %v567_v60, %v562_v3 }
  0xf4   :  { %v459_v63 = vadd.f32 1.0, %v709_v16 }
  0xf5   :  { %v711_v22 = vpop.eup %710  ;;  %v576_v12 = vsel %vm575_vm8, %v574_v2, %v569_v5 }
  0xf6   :  { %720 = vrcp.f32 %v459_v63  ;;  %v581_v6 = vrot.slane %v711_v22, %v580_v61 }
  0xf7   :  { %v713_v9 = vpop.eup %712 }
  0xf8   :  { %v588_v17 = vrot.slane %v713_v9, %v587_v4  ;;  %v583_v18 = vsel %vm582_vm9, %v581_v6, %v576_v12 }
  0xf9   :  { %v715_v11 = vpop.eup %714 }
  0xfa   :  { %v595_v19 = vrot.slane %v715_v11, %v594_v7  ;;  %v590_v25 = vsel %vm589_vm10, %v588_v17, %v583_v18 }
  0xfc   :  { %v597_v27 = vsel %vm596_vm11, %v595_v19, %v590_v25 }
  0xfd   :  { %v717_v24 = vpop.eup %716 }
  0xfe   :  { %v602_v28 = vrot.slane %v717_v24, %v601_v20 }
  0xff   :  { %v719_v26 = vpop.eup %718 }
 0x100   :  { %v609_v29 = vrot.slane %v719_v26, %v608_v23  ;;  %v604_v31 = vsel %vm603_vm12, %v602_v28, %v597_v27 }
 0x102   :  { %v611_v33 = vsel %vm610_vm13, %v609_v29, %v604_v31 }
 0x103   :  { %v721_v32 = vpop.eup %720 }
 0x104   :  { %v616_v34 = vrot.slane %v721_v32, %v615_v30 }
 0x106   :  { %v618_v35 = vsel %vm617_vm14, %v616_v34, %v611_v33 }
 0x107   :  { %620 = vst [vmem:[#allocation8] sm:$0x1] %v618_v35 }
 0x108   :  { %773 = shalt.err (!%p770_p0)
}
 0x109   :  { %630 = dma.vmem_to_hbm [thread:$0]  %s628_s24, 16, %s1000_s3, [#allocation5]  }
 0x10a   :  { %786 = dma.done.wait [#allocation5], 16  }
 0x10b   :  { %787 = vsyncadd [#allocation5], 4294967280 }
 0x10c   :  { %634 = vsyncpa [#allocation4], 1 }
 0x10d   :  { %635 = vsyncpa [#allocation7], 1 }
 0x10e   :  { %636 = vsyncpa [#allocation5], 1 }

</bundles_post_ra>
